<compile_context>
chip_gen: v7x
topology: tpu7x:2x2x1
jax: 0.10.0
libtpu: 0.0.40
codegen_flags: <defaults>
</compile_context>

<pallas_src>
import functools

import jax
import jax.numpy as jnp
from jax.experimental import pallas as pl
from jax.experimental.pallas import tpu as pltpu


TILE_M = 1024          # sweep 512 / 1024 / 2048 per generation; 1024 is a safe default
VMEM_LIMIT_BYTES = 32 * 1024 * 1024   # raises v5e's 16 MiB scoped default; <= v6e/v7x defaults


def _round_up(x, m):
    return ((x + m - 1) // m) * m


# --------------------------------------------------------------------------- #
# Kernel
# --------------------------------------------------------------------------- #
def _head_kernel(x_ref, box_ref, wx_ref, wbox_ref, cz_ref, wsm_ref, bout_ref,
                 out_ref, *, ff_pad):
    # x_ref:    (TILE_M, input_dim)        f32 (cast to bf16 in-kernel)
    # box_ref:  (TILE_M, box_dim)          f32 (cast to bf16 in-kernel)
    # wx_ref:   (input_dim, ff_pad+out)    bf16  (resident; cols = [logits | y_x])
    # wbox_ref: (box_dim,  ff_pad+out)     bf16  (resident; y cols are zero)
    # cz_ref:   (1, ff_pad)                f32   (resident; padded cols = -1e30)
    # wsm_ref:  (ff_pad, out)              bf16  (resident)
    # bout_ref: (1, out)                   f32   (resident)
    # out_ref:  (TILE_M, out)              f32
    x = x_ref[...].astype(jnp.bfloat16)
    b = box_ref[...].astype(jnp.bfloat16)

    # Two accumulating MXU dots replace the XLA-side concat + single wide dot.
    t = (jnp.dot(x, wx_ref[...], preferred_element_type=jnp.float32)
         + jnp.dot(b, wbox_ref[...], preferred_element_type=jnp.float32))

    # Pre-softmax logits (fused box_embedding + dense + feed_forward chain).
    z = t[:, :ff_pad] + cz_ref[...]

    # Numerically stable softmax with DEFERRED normalization: matmul the
    # unnormalized exponentials, then scale the 4-wide result by 1/denom.
    m = jnp.max(z, axis=-1, keepdims=True)
    e = jnp.exp(z - m)                                  # padded cols -> exactly 0
    denom = jnp.sum(e, axis=-1, keepdims=True)
    num = jnp.dot(e.astype(wsm_ref.dtype), wsm_ref[...],
                  preferred_element_type=jnp.float32)

    y = t[:, ff_pad:] + num * pl.reciprocal(denom, approx=True) + bout_ref[...]
    out_ref[...] = jax.nn.sigmoid(y)


# --------------------------------------------------------------------------- #
# Host-side weight fusion / padding (runs inside jit -> fused, tiny)
# --------------------------------------------------------------------------- #
def _fuse_and_pad(params, input_dim, box_dim, ff_dim, output_dim):
    ff_pad = _round_up(ff_dim, 128)

    wb, bb = params["wb"], params["bb"]                 # (box, 64), (1, 64)
    wd_x, wd_b, bd = params["wd_x"], params["wd_b"], params["bd"]
    wf, bf = params["wf"], params["bf"]                 # (64, ff), (1, ff)
    wf2_x, wf2_s, bf2 = params["wf2_x"], params["wf2_s"], params["bf2"]

    box_emb = wd_b + jnp.eye(wd_b.shape[0], dtype=jnp.float32)   # (wd_b + I)
    be_wf = box_emb @ wf                                         # (64, ff)

    A = wd_x @ wf                                       # x   -> logits  (in,  ff)
    Bm = wb @ be_wf                                     # box -> logits  (box, ff)
    cz = bb @ be_wf + bd @ wf + bf                      # bias -> logits (1,   ff)

    pad_ff = ff_pad - ff_dim
    # Weight pads are zeros; bias pad is -1e30 (stays f32) so softmax ignores it.
    A_p = jnp.pad(A, ((0, 0), (0, pad_ff)))
    B_p = jnp.pad(Bm, ((0, 0), (0, pad_ff)))
    cz_p = jnp.pad(cz, ((0, 0), (0, pad_ff)), constant_values=-1e30)
    wsm_p = jnp.pad(wf2_s, ((0, pad_ff), (0, 0)))       # (ff_pad, out)

    # Per-source fused weights: columns = [logits | y_x-branch].
    w_x = jnp.concatenate([A_p, wf2_x], axis=1).astype(jnp.bfloat16)          # (in,  ff_pad+out)
    w_box = jnp.concatenate(
        [B_p, jnp.zeros((box_dim, output_dim), jnp.float32)], axis=1
    ).astype(jnp.bfloat16)                                                    # (box, ff_pad+out)

    return (w_x, w_box,
            cz_p.astype(jnp.float32),
            wsm_p.astype(jnp.bfloat16),
            bf2.astype(jnp.float32),
            ff_pad)


# --------------------------------------------------------------------------- #
# Wrapper
# --------------------------------------------------------------------------- #
def _m_axis_semantics(num_m_blocks):
    """CORE_PARALLEL on v7x (2 TCs/chip) so the M grid really shards across cores."""
    try:
        kind = jax.devices()[0].device_kind.lower()
    except Exception:
        kind = ""
    core_parallel = getattr(pltpu, "CORE_PARALLEL", pltpu.PARALLEL)
    if "v7" in kind and num_m_blocks >= 2:
        return (core_parallel,)
    return (pltpu.PARALLEL,)


def _linear_head_forward(x_input, box, params):
    """x_input: (B, S, input_dim), box: (B, S, box_dim) -> (wh, xy, None, None, None)."""
    B, S, input_dim = x_input.shape
    box_dim = box.shape[-1]
    output_dim = params["bf2"].shape[-1]
    ff_dim = params["bf"].shape[-1]
    M = B * S

    w_x, w_box, cz, w_sm, b_out, ff_pad = _fuse_and_pad(
        params, input_dim, box_dim, ff_dim, output_dim)

    # Pure reshapes only -- no concat / cast / pad of the activation stream in XLA.
    x2 = x_input.reshape(M, input_dim)
    b2 = box.reshape(M, box_dim)

    tile_m = M if M <= TILE_M else TILE_M        # partial last tile handled by Pallas masking
    num_m_blocks = pl.cdiv(M, tile_m)
    grid = (num_m_blocks,)

    kernel = functools.partial(_head_kernel, ff_pad=ff_pad)

    out = pl.pallas_call(
        kernel,
        out_shape=jax.ShapeDtypeStruct((M, output_dim), jnp.float32),
        grid=grid,
        in_specs=[
            pl.BlockSpec((tile_m, input_dim), lambda i: (i, 0)),             # x:      tiled over M
            pl.BlockSpec((tile_m, box_dim), lambda i: (i, 0)),               # box:    tiled over M
            pl.BlockSpec((input_dim, ff_pad + output_dim), lambda i: (0, 0)),  # w_x:   resident
            pl.BlockSpec((box_dim, ff_pad + output_dim), lambda i: (0, 0)),    # w_box: resident
            pl.BlockSpec((1, ff_pad), lambda i: (0, 0)),                       # cz:    resident
            pl.BlockSpec((ff_pad, output_dim), lambda i: (0, 0)),              # w_sm:  resident
            pl.BlockSpec((1, output_dim), lambda i: (0, 0)),                   # b_out: resident
        ],
        out_specs=pl.BlockSpec((tile_m, output_dim), lambda i: (i, 0)),        # compact 4-wide output
        compiler_params=pltpu.CompilerParams(
            dimension_semantics=_m_axis_semantics(num_m_blocks),
            vmem_limit_bytes=VMEM_LIMIT_BYTES),
    )(x2, b2, w_x, w_box, cz, w_sm, b_out)

    y = out.reshape(B, S, output_dim)
    xy = y[:, :, :2]
    wh = y[:, :, 2:]
    return (wh, xy, None, None, None)


# jit the whole forward so weight fusion / reshapes fuse into the graph.
linear_head_forward = jax.jit(_linear_head_forward)


# --------------------------------------------------------------------------- #
# Params (nn.Linear-style, stored (in, out)) and pure-JAX reference
# --------------------------------------------------------------------------- #
def init_params(key, input_dim, box_dim, output_dim, box_emb_size=64):
    ff_dim = output_dim * 8 * 14
    keys = jax.random.split(key, 8)

    def lin(kw, kb, fan_in, fan_out):
        bound = 1.0 / jnp.sqrt(fan_in)
        w = jax.random.uniform(kw, (fan_in, fan_out), jnp.float32, -bound, bound)
        b = jax.random.uniform(kb, (1, fan_out), jnp.float32, -bound, bound)
        return w, b

    wb, bb = lin(keys[0], keys[1], box_dim, box_emb_size)
    wd, bd = lin(keys[2], keys[3], input_dim + box_emb_size, box_emb_size)
    wf, bf = lin(keys[4], keys[5], box_emb_size, ff_dim)
    wf2, bf2 = lin(keys[6], keys[7], ff_dim + input_dim, output_dim)

    return {
        "wb": wb, "bb": bb,
        "wd_x": wd[:input_dim], "wd_b": wd[input_dim:], "bd": bd,
        "wf": wf, "bf": bf,
        "wf2_x": wf2[:input_dim], "wf2_s": wf2[input_dim:], "bf2": bf2,
    }


def reference_forward(x_input, box, params):
    """Unfused pure-JAX f32 reference mirroring the PyTorch head (with concat)."""
    be = jnp.einsum("bsd,do->bso", box, params["wb"]) + params["bb"][0]
    cat1 = jnp.concatenate([x_input, be], axis=-1)
    wd = jnp.concatenate([params["wd_x"], params["wd_b"]], axis=0)
    h = jnp.einsum("bsd,do->bso", cat1, wd) + params["bd"][0]
    z = jnp.einsum("bsd,do->bso", h + be, params["wf"]) + params["bf"][0]
    sm = jax.nn.softmax(z, axis=-1)
    cat2 = jnp.concatenate([x_input, sm], axis=-1)
    wf2 = jnp.concatenate([params["wf2_x"], params["wf2_s"]], axis=0)
    y = jax.nn.sigmoid(jnp.einsum("bsd,do->bso", cat2, wf2) + params["bf2"][0])
    return y[:, :, 2:], y[:, :, :2]


if __name__ == "__main__":
    B, S = 2, 8
    input_dim, box_dim, output_dim = 32, 4, 4

    key = jax.random.PRNGKey(0)
    kx, kb, kp = jax.random.split(key, 3)
    x_input = jax.random.normal(kx, (B, S, input_dim), jnp.float32)
    box = jax.random.normal(kb, (B, S, box_dim), jnp.float32)
    params = init_params(kp, input_dim, box_dim, output_dim)

    wh, xy, _, _, _ = linear_head_forward(x_input, box, params)
    jax.block_until_ready((wh, xy))

    wh_ref, xy_ref = reference_forward(x_input, box, params)
    assert wh.shape == (B, S, output_dim - 2) and xy.shape == (B, S, 2)
    # bf16 matmul operands + approx reciprocal -> loosened (but still tight) tolerance.
    assert jnp.allclose(wh, wh_ref, atol=1e-2), float(jnp.max(jnp.abs(wh - wh_ref)))
    assert jnp.allclose(xy, xy_ref, atol=1e-2), float(jnp.max(jnp.abs(xy - xy_ref)))

    print("KERNEL_OK")
</pallas_src>

<mosaic_0001>
module attributes {stable_mosaic.version = 11 : i64} {
  func.func @_head_kernel(%arg0: i32, %arg1: memref<16x32xf32, #tpu.memory_space<vmem>>, %arg2: memref<16x4xf32, #tpu.memory_space<vmem>>, %arg3: memref<32x516xbf16, #tpu.memory_space<vmem>>, %arg4: memref<4x516xbf16, #tpu.memory_space<vmem>>, %arg5: memref<1x512xf32, #tpu.memory_space<vmem>>, %arg6: memref<512x4xbf16, #tpu.memory_space<vmem>>, %arg7: memref<1x4xf32, #tpu.memory_space<vmem>>, %arg8: memref<16x4xf32, #tpu.memory_space<vmem>>) attributes {dimension_semantics = [#tpu.dimension_semantics<parallel>], iteration_bounds = array<i64: 1>, scalar_prefetch = 0 : i64, scratch_operands = 0 : i64, tpu.core_type = #tpu.core_type<tc>, window_params = [{transform_indices = @transform_0, window_bounds = array<i64: 16, 32>}, {transform_indices = @transform_1, window_bounds = array<i64: 16, 4>}, {pipeline_mode = #tpu.pipeline_mode<synchronous>, transform_indices = @transform_2, window_bounds = array<i64: 32, 516>}, {pipeline_mode = #tpu.pipeline_mode<synchronous>, transform_indices = @transform_3, window_bounds = array<i64: 4, 516>}, {pipeline_mode = #tpu.pipeline_mode<synchronous>, transform_indices = @transform_4, window_bounds = array<i64: 1, 512>}, {pipeline_mode = #tpu.pipeline_mode<synchronous>, transform_indices = @transform_5, window_bounds = array<i64: 512, 4>}, {pipeline_mode = #tpu.pipeline_mode<synchronous>, transform_indices = @transform_6, window_bounds = array<i64: 1, 4>}, {transform_indices = @transform_7, window_bounds = array<i64: 16, 4>}]} {
    %c0 = arith.constant 0 : index
    %c0_0 = arith.constant 0 : index
    %0 = vector.load %arg1[%c0, %c0_0] : memref<16x32xf32, #tpu.memory_space<vmem>>, vector<16x32xf32>
    %1 = arith.truncf %0 : vector<16x32xf32> to vector<16x32xbf16>
    %c0_1 = arith.constant 0 : index
    %c0_2 = arith.constant 0 : index
    %2 = vector.load %arg2[%c0_1, %c0_2] : memref<16x4xf32, #tpu.memory_space<vmem>>, vector<16x4xf32>
    %3 = arith.truncf %2 : vector<16x4xf32> to vector<16x4xbf16>
    %c0_3 = arith.constant 0 : index
    %c0_4 = arith.constant 0 : index
    %4 = vector.load %arg3[%c0_3, %c0_4] : memref<32x516xbf16, #tpu.memory_space<vmem>>, vector<32x516xbf16>
    %cst = arith.constant dense<0.000000e+00> : vector<16x516xf32>
    %5 = tpu.matmul %1, %4, %cst {dimension_numbers = #tpu.dot_dimension_numbers<[1], [0], [0], [1], [0, 0, 1, 1], [], []>} : vector<16x32xbf16>, vector<32x516xbf16>, vector<16x516xf32> -> vector<16x516xf32>
    %c0_5 = arith.constant 0 : index
    %c0_6 = arith.constant 0 : index
    %6 = vector.load %arg4[%c0_5, %c0_6] : memref<4x516xbf16, #tpu.memory_space<vmem>>, vector<4x516xbf16>
    %cst_7 = arith.constant dense<0.000000e+00> : vector<16x516xf32>
    %7 = tpu.matmul %3, %6, %cst_7 {dimension_numbers = #tpu.dot_dimension_numbers<[1], [0], [0], [1], [0, 0, 1, 1], [], []>} : vector<16x4xbf16>, vector<4x516xbf16>, vector<16x516xf32> -> vector<16x516xf32>
    %8 = arith.addf %5, %7 : vector<16x516xf32>
    %9 = vector.extract_strided_slice %8 {offsets = [0, 0], sizes = [16, 512], strides = [1, 1]} : vector<16x516xf32> to vector<16x512xf32>
    %c0_8 = arith.constant 0 : index
    %c0_9 = arith.constant 0 : index
    %10 = vector.load %arg5[%c0_8, %c0_9] : memref<1x512xf32, #tpu.memory_space<vmem>>, vector<1x512xf32>
    %11 = vector.broadcast %10 : vector<1x512xf32> to vector<16x512xf32>
    %12 = arith.addf %9, %11 : vector<16x512xf32>
    %cst_10 = arith.constant dense<0xFF800000> : vector<16xf32>
    %13 = vector.multi_reduction <maximumf>, %12, %cst_10 [1] : vector<16x512xf32> to vector<16xf32>
    %14 = vector.shape_cast %13 : vector<16xf32> to vector<16x1xf32>
    %15 = vector.broadcast %14 : vector<16x1xf32> to vector<16x512xf32>
    %16 = arith.subf %12, %15 : vector<16x512xf32>
    %17 = math.exp %16 : vector<16x512xf32>
    %cst_11 = arith.constant dense<0.000000e+00> : vector<16xf32>
    %18 = vector.multi_reduction <add>, %17, %cst_11 [1] : vector<16x512xf32> to vector<16xf32>
    %19 = vector.shape_cast %18 : vector<16xf32> to vector<16x1xf32>
    %20 = arith.truncf %17 : vector<16x512xf32> to vector<16x512xbf16>
    %c0_12 = arith.constant 0 : index
    %c0_13 = arith.constant 0 : index
    %21 = vector.load %arg6[%c0_12, %c0_13] : memref<512x4xbf16, #tpu.memory_space<vmem>>, vector<512x4xbf16>
    %cst_14 = arith.constant dense<0.000000e+00> : vector<16x4xf32>
    %22 = tpu.matmul %20, %21, %cst_14 {dimension_numbers = #tpu.dot_dimension_numbers<[1], [0], [0], [1], [0, 0, 1, 1], [], []>} : vector<16x512xbf16>, vector<512x4xbf16>, vector<16x4xf32> -> vector<16x4xf32>
    %23 = vector.extract_strided_slice %8 {offsets = [0, 512], sizes = [16, 4], strides = [1, 1]} : vector<16x516xf32> to vector<16x4xf32>
    %24 = tpu.reciprocal %19 {approx = true} : vector<16x1xf32> -> vector<16x1xf32>
    %25 = vector.broadcast %24 : vector<16x1xf32> to vector<16x4xf32>
    %26 = arith.mulf %22, %25 : vector<16x4xf32>
    %27 = arith.addf %23, %26 : vector<16x4xf32>
    %c0_15 = arith.constant 0 : index
    %c0_16 = arith.constant 0 : index
    %28 = vector.load %arg7[%c0_15, %c0_16] : memref<1x4xf32, #tpu.memory_space<vmem>>, vector<1x4xf32>
    %29 = vector.broadcast %28 : vector<1x4xf32> to vector<16x4xf32>
    %30 = arith.addf %27, %29 : vector<16x4xf32>
    %31 = arith.negf %30 : vector<16x4xf32>
    %32 = math.exp %31 : vector<16x4xf32>
    %cst_17 = arith.constant 1.000000e+00 : f32
    %33 = vector.broadcast %cst_17 : f32 to vector<16x4xf32>
    %34 = arith.addf %33, %32 : vector<16x4xf32>
    %35 = arith.divf %33, %34 : vector<16x4xf32>
    %c0_18 = arith.constant 0 : index
    %c0_19 = arith.constant 0 : index
    %36 = vector.load %arg8[%c0_18, %c0_19] : memref<16x4xf32, #tpu.memory_space<vmem>>, vector<16x4xf32>
    tpu.vector_store %arg8[%c0_18, %c0_19], %35 {strides = array<i32>} : memref<16x4xf32, #tpu.memory_space<vmem>>, vector<16x4xf32>,
    return
  }
  func.func @transform_0(%arg0: i32) -> (i32, i32) {
    %c0_i32 = arith.constant 0 : i32
    %c0_i32_0 = arith.constant 0 : i32
    return %arg0, %c0_i32 : i32, i32
  }
  func.func @transform_1(%arg0: i32) -> (i32, i32) {
    %c0_i32 = arith.constant 0 : i32
    %c0_i32_0 = arith.constant 0 : i32
    return %arg0, %c0_i32 : i32, i32
  }
  func.func @transform_2(%arg0: i32) -> (i32, i32) {
    %c0_i32 = arith.constant 0 : i32
    %c0_i32_0 = arith.constant 0 : i32
    %c0_i32_1 = arith.constant 0 : i32
    return %c0_i32, %c0_i32_0 : i32, i32
  }
  func.func @transform_3(%arg0: i32) -> (i32, i32) {
    %c0_i32 = arith.constant 0 : i32
    %c0_i32_0 = arith.constant 0 : i32
    %c0_i32_1 = arith.constant 0 : i32
    return %c0_i32, %c0_i32_0 : i32, i32
  }
  func.func @transform_4(%arg0: i32) -> (i32, i32) {
    %c0_i32 = arith.constant 0 : i32
    %c0_i32_0 = arith.constant 0 : i32
    %c0_i32_1 = arith.constant 0 : i32
    return %c0_i32, %c0_i32_0 : i32, i32
  }
  func.func @transform_5(%arg0: i32) -> (i32, i32) {
    %c0_i32 = arith.constant 0 : i32
    %c0_i32_0 = arith.constant 0 : i32
    %c0_i32_1 = arith.constant 0 : i32
    return %c0_i32, %c0_i32_0 : i32, i32
  }
  func.func @transform_6(%arg0: i32) -> (i32, i32) {
    %c0_i32 = arith.constant 0 : i32
    %c0_i32_0 = arith.constant 0 : i32
    %c0_i32_1 = arith.constant 0 : i32
    return %c0_i32, %c0_i32_0 : i32, i32
  }
  func.func @transform_7(%arg0: i32) -> (i32, i32) {
    %c0_i32 = arith.constant 0 : i32
    %c0_i32_0 = arith.constant 0 : i32
    return %arg0, %c0_i32 : i32, i32
  }
}

</mosaic_0001>

<bundles_post_ra>
// kernel: _linear_head_forward.1
= control target key start
LH: loop header
LB: loop body
LE: loop exit
PB: predicated region body
PF: predicated region fallthrough
CT: control target
= control target key end

     0   :  { %v53_v0 = vlaneseq  ;;  %v1056_v2 = vmov 1983009808   ;;  %v1057_v4 = vmov 0   ;;  %vm77_vm0 = vcmask 1041408   ;;  %s1313_s3 = inlined_call_operand.vmem [shape: bf16[4,516], index: 3, kind: input, shape index: {}]   ;;  %s1314_s2 = inlined_call_operand.vmem [shape: bf16[32,516], index: 2, kind: input, shape index: {}]   ;;  %s1315_s1 = inlined_call_operand.vmem [shape: f32[16,4], index: 1, kind: input, shape index: {}]   ;;  %s1316_s0 = inlined_call_operand.vmem [shape: f32[16,32], index: 0, kind: input, shape index: {}]   ;;  %s1317_s5 = inlined_call_operand.vmem [shape: bf16[512,4], index: 5, kind: input, shape index: {}]   ;;  %s1318_s4 = inlined_call_operand.vmem [shape: f32[1,512], index: 4, kind: input, shape index: {}]   ;;  %s1319_s6 = inlined_call_operand.vmem [shape: f32[1,4], index: 6, kind: input, shape index: {}]   ;;  %s1320_s7 = inlined_call_operand.vmem [shape: f32[16,4], index: 7, kind: output, shape index: {}]  }
   0x1   :  { %v45_v1 = vld [vmem:[%s1313_s3] sm:$0xff]  ;;  %v51_v3 = vunpack.c.l.s4 %v1056_v2  ;;  %125 = vmatprep.mubr.bf16.mxu0 %v1057_v4  ;;  %168 = vmatprep.mubr.bf16.mxu1 %v1057_v4  ;;  %v31_v12 = vld [vmem:[%s1315_s1 + $0x8] sm:$0xff]  ;;  %vm73_vm1 = vcmask 31744   ;;  %v1058_v21 = vmov 0.0   ;;  %vm1059_vm2 = vmmov 0   ;;  %v1004_v42 = vld [vmem:[%s1317_s5 + $0x50] sm:$0xff]  }
   0x2   :  { %v1103_v5 = vshrl.u32 %v53_v0, 7  ;;  %v49_v7 = vcombine.high %v45_v1, %v45_v1  ;;  %v30_v11 = vld [vmem:[%s1315_s1] sm:$0xff]  ;;  %v852_v13 = vld.sshfl [vmem:[%s1313_s3 + $0x8] sm:$0x3 pattern:$0x76325410] }
   0x3   :  { %v52_v6 = vunpack.c.0.s8 %v51_v3  ;;  %v984_v18 = vld [vmem:[%s1314_s2 + $0xc] ss:$20 sps:$4 sm:$0xff]   ;;  %v32_v19 = vpack.c.bf16 %v31_v12, %v30_v11  ;;  %v982_v20 = vld [vmem:[%s1314_s2 + $0x8] ss:$20 sps:$4 sm:$0xff]   ;;  %v91_v22 = vsel %vm77_vm0, %v852_v13, 0  ;;  %vm272_vm3 = vcmask 261120  }
   0x4   :  { %v987_v23 = vld [vmem:[%s1314_s2 + $0x4] ss:$20 sps:$4 sm:$0xff]   ;;  %v990_v24 = vld [vmem:[%s1314_s2 + $0x34] ss:$20 sps:$4 sm:$0xff]   ;;  %v993_v29 = vld [vmem:[%s1314_s2 + $0x2c] ss:$20 sps:$4 sm:$0xff]  }
   0x5   :  { %v55_v8 = vsub.s32 %v52_v6, %v1103_v5  ;;  %v988_v25 = vld [vmem:[%s1314_s2 + $0x30] ss:$20 sps:$4 sm:$0xff]   ;;  %v985_v26 = vld [vmem:[%s1314_s2] ss:$20 sps:$4 sm:$0xff]   ;;  %v28_v28 = vld [vmem:[%s1316_s0 + $0x8] sm:$0xff]  ;;  %v415_v48 = vsub.s32 2, %v1103_v5 }
   0x6   :  { %v27_v27 = vld [vmem:[%s1316_s0] sm:$0xff]  ;;  %v991_v31 = vld [vmem:[%s1314_s2 + $0x28] ss:$20 sps:$4 sm:$0xff]   ;;  %v995_v33 = vld [vmem:[%s1314_s2 + $0x38] ss:$20 sps:$4 sm:$0xff]   ;;  %v407_v49 = vsub.s32 0, %v1103_v5 }
   0x7   :  { %v56_v9 = vrot.slane %v45_v1, %v55_v8  ;;  %v63_v10 = vrot.slane %v49_v7, %v55_v8  ;;  %v29_v30 = vpack.c.bf16 %v28_v28, %v27_v27  ;;  %v994_v32 = vld [vmem:[%s1314_s2 + $0x10] ss:$20 sps:$4 sm:$0xff]   ;;  %v1000_v38 = vld [vmem:[%s1317_s5 + $0x48] sm:$0xff]   ;;  %v403_v51 = vld [vmem:[%s1318_s4] sm:$0xf]  ;;  %v419_v52 = vsub.s32 3, %v1103_v5 }
   0x8   :  { %v996_v34 = vld [vmem:[%s1317_s5 + $0x40] sm:$0xff]   ;;  %v1001_v39 = vld [vmem:[%s1317_s5 + $0xc8] sm:$0xff]   ;;  %v1005_v43 = vld [vmem:[%s1317_s5 + $0xd0] sm:$0xff]   ;;  %v411_v53 = vsub.s32 1, %v1103_v5  ;;  %v416_v56 = vrot.slane %v403_v51, %v415_v48  ;;  %v408_v58 = vrot.slane %v403_v51, %v407_v49 }
   0x9   :  { %v64_v14 = vcombine.high %v56_v9, %v56_v9  ;;  %v65_v15 = vcombine.high %v63_v10, %v63_v10  ;;  %v79_v16 = vsel %vm77_vm0, %v56_v9, 0  ;;  %v85_v17 = vsel %vm77_vm0, %v63_v10, 0  ;;  %v997_v35 = vld [vmem:[%s1317_s5 + $0xc0] sm:$0xff]   ;;  %v1002_v40 = vld [vmem:[%s1317_s5 + $0x8] sm:$0xff]   ;;  %v1006_v44 = vld [vmem:[%s1317_s5 + $0x10] sm:$0xff]  }
   0xa   :  { %v998_v36 = vld [vmem:[%s1317_s5] sm:$0xff]   ;;  %v1003_v41 = vld [vmem:[%s1317_s5 + $0x88] sm:$0xff]   ;;  %v1007_v45 = vld [vmem:[%s1317_s5 + $0x90] sm:$0xff]   ;;  %v420_v59 = vrot.slane %v403_v51, %v419_v52  ;;  %v412_v61 = vrot.slane %v403_v51, %v411_v53 }
   0xb   :  { %853 = vmatprep.subr.msk.bf16.mxu0 %vm77_vm0, %v64_v14  ;;  %855 = vmatprep.subr.msk.bf16.mxu1 %vm77_vm0, %v65_v15  ;;  %v999_v37 = vld [vmem:[%s1317_s5 + $0x80] sm:$0xff]  }
   0xc   :  { %94 = vmatpush1.bf16.msra.mxu0 %v79_v16  ;;  %137 = vmatpush1.bf16.msra.mxu1 %v85_v17  ;;  %v1012_v27 = vld [vmem:[%s1317_s5 + $0x60] sm:$0xff]  }
   0xd   :  { %955 = vmatprep.subr.bf16.mxu0 %v1058_v21  ;;  %319 = vmatprep.subr.bf16.mxu1 %v984_v18  ;;  %v1013_v28 = vld [vmem:[%s1317_s5 + $0xe0] sm:$0xff]  }
   0xf   :  { %854 = vmatmul.mubr.msk.bf16.vlgmr.msra.gmra.mrb[0].mxu0 %vm73_vm1, %v32_v19  ;;  %856 = vmatmul.mubr.msk.bf16.vlgmr.msra.gmra.mrb[0].mxu1 %vm73_vm1, %v32_v19 }
  0x10   :  { %956 = vmatpush3.bf16.msra.mxu0 %v91_v22  ;;  %320 = vmatpush1.bf16.msra.mxu1 %v982_v20 }
  0x11   :  { %957 = vmatprep.mubr.msk.bf16.mxu0 %vm1059_vm2, %v1058_v21  ;;  %276 = vmatprep.subr.bf16.mxu0 %v987_v23  ;;  %v1008_v23 = vld [vmem:[%s1317_s5 + $0x58] sm:$0xff]  }
  0x12   :  { %321 = vmatprep.subr.bf16.mxu1 %v990_v24  ;;  %351 = vmatprep.mubr.bf16.mxu1 %v1057_v4  ;;  %v1009_v24 = vld [vmem:[%s1317_s5 + $0xd8] sm:$0xff]  }
  0x14   :  { %322 = vmatpush1.bf16.msra.mxu1 %v988_v25  ;;  %v1010_v25 = vld [vmem:[%s1317_s5 + $0x18] sm:$0xff]  }
  0x15   :  { %961 = vmatprep.subr.bf16.mxu1 %v1058_v21 }
  0x17   :  { %958 = vmatmul.mubr.msk.bf16.vlgmr.msra.gmra.mrb[4].mxu0 %vm73_vm1, %v32_v19 }
  0x18   :  { %277 = vmatpush1.bf16.msra.mxu0 %v985_v26  ;;  %308 = vmatprep.mubr.bf16.mxu0 %v1057_v4  ;;  %v1011_v26 = vld [vmem:[%s1317_s5 + $0x98] sm:$0xff]  }
  0x19   :  { %278 = vmatprep.subr.bf16.mxu0 %v993_v29  ;;  %v1014_v29 = vld [vmem:[%s1317_s5 + $0x20] sm:$0xff]  }
  0x1b   :  { %869 = vmatmul.mubr.msk.bf16.vlgmr.msra.gmra.mrb[0].mxu1 %vm272_vm3, %v29_v30 }
  0x1c   :  { %279 = vmatpush1.bf16.msra.mxu0 %v991_v31  ;;  %962 = vmatpush3.bf16.msra.mxu1 %v994_v32  ;;  %v1016_v31 = vld [vmem:[%s1317_s5 + $0x68] sm:$0xff]  }
  0x1d   :  { %963 = vmatprep.subr.bf16.mxu1 %v1058_v21  ;;  %965 = vmatprep.mubr.msk.bf16.mxu1 %vm1059_vm2, %v1058_v21  ;;  %v1017_v32 = vld [vmem:[%s1317_s5 + $0xe8] sm:$0xff]  }
  0x1e   :  { %911 = vmatprep.subr.bf16.mxu0 %v996_v34  ;;  %v1019_v34 = vld [vmem:[%s1317_s5 + $0xa8] sm:$0xff]  }
  0x1f   :  { %868 = vmatmul.mubr.msk.bf16.vlgmr.msra.gmra.mrb[0].mxu0 %vm272_vm3, %v29_v30 }
  0x20   :  { %964 = vmatpush3.bf16.msra.mxu1 %v995_v33  ;;  %912 = vmatpush3.bf16.msra.mxu0 %v998_v36  ;;  %v1018_v33 = vld [vmem:[%s1317_s5 + $0x28] sm:$0xff]   ;;  %v1021_v36 = vld [vmem:[%s1317_s5 + $0xf0] sm:$0xff]  }
  0x21   :  { %933 = vmatprep.subr.bf16.mxu1 %v997_v35  ;;  %913 = vmatprep.subr.bf16.mxu0 %v1000_v38  ;;  %v1020_v35 = vld [vmem:[%s1317_s5 + $0x70] sm:$0xff]  }
  0x22   :  { %v1023_v38 = vld [vmem:[%s1317_s5 + $0xb0] sm:$0xff]  }
  0x23   :  { %966 = vmatmul.mubr.msk.bf16.vlgmr.msra.gmra.mrb[4].mxu1 %vm272_vm3, %v29_v30  ;;  %v1015_v30 = vld [vmem:[%s1317_s5 + $0xa0] sm:$0xff]  }
  0x24   :  { %934 = vmatpush3.bf16.msra.mxu1 %v999_v37  ;;  %914 = vmatpush3.bf16.msra.mxu0 %v1002_v40  ;;  %v1022_v37 = vld [vmem:[%s1317_s5 + $0x30] sm:$0xff]   ;;  %v1025_v40 = vld [vmem:[%s1317_s5 + $0xf8] sm:$0xff]  }
  0x25   :  { %935 = vmatprep.subr.bf16.mxu1 %v1001_v39  ;;  %915 = vmatprep.subr.bf16.mxu0 %v1004_v42  ;;  %v1024_v39 = vld [vmem:[%s1317_s5 + $0x78] sm:$0xff]  }
  0x26   :  { %v1027_v42 = vld [vmem:[%s1317_s5 + $0xb8] sm:$0xff]  }
  0x28   :  { %936 = vmatpush3.bf16.msra.mxu1 %v1003_v41  ;;  %916 = vmatpush3.bf16.msra.mxu0 %v1006_v44  ;;  %v1026_v41 = vld [vmem:[%s1317_s5 + $0x38] sm:$0xff]  }
  0x29   :  { %937 = vmatprep.subr.bf16.mxu1 %v1005_v43  ;;  %917 = vmatprep.subr.bf16.mxu0 %v1008_v23 }
  0x2c   :  { %938 = vmatpush3.bf16.msra.mxu1 %v1007_v45  ;;  %918 = vmatpush3.bf16.msra.mxu0 %v1010_v25 }
  0x2d   :  { %939 = vmatprep.subr.bf16.mxu1 %v1009_v24  ;;  %919 = vmatprep.subr.bf16.mxu0 %v1012_v27 }
  0x30   :  { %940 = vmatpush3.bf16.msra.mxu1 %v1011_v26  ;;  %920 = vmatpush3.bf16.msra.mxu0 %v1014_v29 }
  0x31   :  { %941 = vmatprep.subr.bf16.mxu1 %v1013_v28  ;;  %921 = vmatprep.subr.bf16.mxu0 %v1016_v31 }
  0x34   :  { %942 = vmatpush3.bf16.msra.mxu1 %v1015_v30  ;;  %922 = vmatpush3.bf16.msra.mxu0 %v1018_v33 }
  0x35   :  { %943 = vmatprep.subr.bf16.mxu1 %v1017_v32  ;;  %923 = vmatprep.subr.bf16.mxu0 %v1020_v35 }
  0x38   :  { %944 = vmatpush3.bf16.msra.mxu1 %v1019_v34  ;;  %924 = vmatpush3.bf16.msra.mxu0 %v1022_v37 }
  0x39   :  { %945 = vmatprep.subr.bf16.mxu1 %v1021_v36  ;;  %925 = vmatprep.subr.bf16.mxu0 %v1024_v39  ;;  %v903_v36 = vld [vmem:[%s1319_s6] ss:$0 sm:$0xff] }
  0x3c   :  { %946 = vmatpush3.bf16.msra.mxu1 %v1023_v38  ;;  %926 = vmatpush3.bf16.msra.mxu0 %v1026_v41 }
  0x3d   :  { %947 = vmatprep.subr.bf16.mxu1 %v1025_v40 }
  0x40   :  { %948 = vmatpush3.bf16.msra.mxu1 %v1027_v42 }
  0xea   :  { %v213_v46 = vpop.f32.mrb[4].mxu0 }
  0xeb   :  { %v959_v47 = vpop.f32.mrb[5].mxu0 }
  0xec   :  { %v216_v50 = vpop.f32.mrb[6].mxu0 }
  0xed   :  { %v960_v54 = vpop.f32.mrb[7].mxu0 }
  0xee   :  { %v353_v55 = vpop.f32.mrb[0].mxu1 }
  0xef   :  { %v355_v57 = vpop.f32.mrb[1].mxu1  ;;  %v1204_v0 = vadd.f32 %v416_v56, %v353_v55 }
  0xf0   :  { %v357_v60 = vpop.f32.mrb[2].mxu1  ;;  %v1208_v3 = vadd.f32 %v420_v59, %v355_v57 }
  0xf1   :  { %v359_v62 = vpop.f32.mrb[3].mxu1  ;;  %v1216_v9 = vadd.f32 %v416_v56, %v357_v60 }
  0xf2   :  { %v310_v63 = vpop.f32.mrb[0].mxu0  ;;  %v1218_v10 = vadd.f32 %v420_v59, %v359_v62 }
  0xf3   :  { %v1206_v1 = vadd.f32 %v408_v58, %v310_v63  ;;  %v312_v2 = vpop.f32.mrb[1].mxu0 }
  0xf4   :  { %v1210_v4 = vadd.f32 %v412_v61, %v312_v2  ;;  %v314_v5 = vpop.f32.mrb[2].mxu0 }
  0xf5   :  { %v1212_v6 = vadd.f32 %v408_v58, %v314_v5  ;;  %v316_v7 = vpop.f32.mrb[3].mxu0  ;;  %v433_v8 = vmax.f32 %v1206_v1, %v1204_v0 }
  0xf6   :  { %v1220_v11 = vadd.f32 %v412_v61, %v316_v7  ;;  %v396_v12 = vpop.f32.mrb[4].mxu1  ;;  %v434_v13 = vmax.f32 %v1210_v4, %v1208_v3 }
  0xf7   :  { %v1224_v14 = vadd.f32 %v396_v12, %v213_v46  ;;  %v967_v15 = vpop.f32.mrb[5].mxu1  ;;  %v438_v16 = vmax.f32 %v1212_v6, %v1216_v9 }
  0xf8   :  { %v439_v17 = vmax.f32 %v1220_v11, %v1218_v10  ;;  %v399_v18 = vpop.f32.mrb[6].mxu1  ;;  %v435_v19 = vmax.f32 %v433_v8, %v434_v13 }
  0xf9   :  { %v1230_v20 = vadd.f32 %v399_v18, %v216_v50  ;;  %v968_v21 = vpop.f32.mrb[7].mxu1 }
  0xfa   :  { %436 = vmax.xlane.f32.xlu0 %v435_v19  ;;  %v440_v22 = vmax.f32 %v438_v16, %v439_v17 }
  0xfe   :  { %441 = vmax.xlane.f32.xlu0 %v440_v22 }
 0x187   :  { %v437_v43 = vpop.xlane.xlu0 %436 }
 0x188   :  { %v443_v44 = vsub.f32 %v1206_v1, %v437_v43  ;;  %v444_v45 = vsub.f32 %v1210_v4, %v437_v43  ;;  %v445_v46 = vsub.f32 %v1204_v0, %v437_v43  ;;  %v446_v47 = vsub.f32 %v1208_v3, %v437_v43 }
 0x18a   :  { %v451_v48 = vmul.f32 1.442695, %v443_v44  ;;  %v453_v49 = vmul.f32 1.442695, %v444_v45  ;;  %v455_v50 = vmul.f32 1.442695, %v445_v46 }
 0x18b   :  { %v457_v51 = vmul.f32 1.442695, %v446_v47  ;;  %v442_v52 = vpop.xlane.xlu0 %441 }
 0x18c   :  { %1028 = vpow2.f32 %v451_v48  ;;  %v447_v53 = vsub.f32 %v1212_v6, %v442_v52  ;;  %v448_v54 = vsub.f32 %v1220_v11, %v442_v52  ;;  %v449_v55 = vsub.f32 %v1216_v9, %v442_v52 }
 0x18d   :  { %1030 = vpow2.f32 %v453_v49  ;;  %v450_v56 = vsub.f32 %v1218_v10, %v442_v52 }
 0x18e   :  { %1032 = vpow2.f32 %v455_v50  ;;  %v459_v57 = vmul.f32 1.442695, %v447_v53  ;;  %v461_v58 = vmul.f32 1.442695, %v448_v54  ;;  %v463_v59 = vmul.f32 1.442695, %v449_v55 }
 0x18f   :  { %1034 = vpow2.f32 %v457_v51  ;;  %v465_v60 = vmul.f32 1.442695, %v450_v56 }
 0x190   :  { %1036 = vpow2.f32 %v459_v57 }
 0x191   :  { %1038 = vpow2.f32 %v461_v58 }
 0x192   :  { %1040 = vpow2.f32 %v463_v59 }
 0x193   :  { %1042 = vpow2.f32 %v465_v60 }
 0x196   :  { %v1029_v61 = vpop.eup %1028 }
 0x197   :  { %v1031_v62 = vpop.eup %1030 }
 0x198   :  { %v1033_v63 = vpop.eup %1032  ;;  %v467_v0 = vadd.f32 %v1031_v62, %v1029_v61 }
 0x199   :  { %v1035_v1 = vpop.eup %1034 }
 0x19a   :  { %v1037_v2 = vpop.eup %1036  ;;  %v468_v3 = vadd.f32 %v1033_v63, %v467_v0 }
 0x19b   :  { %v1039_v4 = vpop.eup %1038  ;;  %v477_v5 = vpack.c.bf16 %v1037_v2, %v1029_v61 }
 0x19c   :  { %v1041_v6 = vpop.eup %1040  ;;  %v469_v7 = vadd.f32 %v1035_v1, %v468_v3  ;;  %v478_v8 = vpack.c.bf16 %v1039_v4, %v1031_v62  ;;  %v472_v9 = vadd.f32 %v1039_v4, %v1037_v2 }
 0x19d   :  { %v1043_v10 = vpop.eup %1042  ;;  %v479_v11 = vpack.c.bf16 %v1041_v6, %v1033_v63 }
 0x19e   :  { %470 = vadd.xlane.f32.xlu1 %v469_v7  ;;  %769 = vmatprep.mubr.bf16.mxu0 %v478_v8  ;;  %v480_v12 = vpack.c.bf16 %v1043_v10, %v1035_v1  ;;  %v473_v13 = vadd.f32 %v1041_v6, %v472_v9 }
 0x19f   :  { %770 = vmatmul.mubr.bf16.vlgmr.msra.gmra.mrb[8].mxu0 %v477_v5 }
 0x1a0   :  { %810 = vmatprep.mubr.bf16.mxu1 %v480_v12  ;;  %v474_v15 = vadd.f32 %v1043_v10, %v473_v13 }
 0x1a1   :  { %811 = vmatmul.mubr.bf16.vlgmr.msra.gmra.mrb[8].mxu1 %v479_v11 }
 0x1a2   :  { %475 = vadd.xlane.f32.xlu1 %v474_v15 }
 0x22b   :  { %v471_v16 = vpop.xlane.xlu1 %470 }
 0x22c   :  { %1044 = vrcp.f32 %v471_v16 }
 0x22f   :  { %v476_v17 = vpop.xlane.xlu1 %475 }
 0x230   :  { %1046 = vrcp.f32 %v476_v17 }
 0x236   :  { %v1045_v32 = vpop.eup %1044 }
 0x23a   :  { %v1047_v35 = vpop.eup %1046 }
 0x272   :  { %v927_v18 = vpop.f32.mrb[8].mxu0 }
 0x273   :  { %v928_v19 = vpop.f32.mrb[9].mxu0 }
 0x274   :  { %v949_v21 = vpop.f32.mrb[8].mxu1  ;;  %v929_v22 = vadd.f32 %v928_v19, %v927_v18  ;;  %v930_v23 = vpop.f32.mrb[10].mxu0 }
 0x275   :  { %v950_v24 = vpop.f32.mrb[9].mxu1  ;;  %v931_v25 = vpop.f32.mrb[11].mxu0 }
 0x276   :  { %v951_v26 = vadd.f32 %v950_v24, %v949_v21  ;;  %v952_v27 = vpop.f32.mrb[10].mxu1  ;;  %v932_v28 = vadd.f32 %v931_v25, %v930_v23 }
 0x277   :  { %v953_v29 = vpop.f32.mrb[11].mxu1 }
 0x278   :  { %v813_v30 = vadd.f32 %v951_v26, %v929_v22  ;;  %v954_v31 = vadd.f32 %v953_v29, %v952_v27 }
 0x27a   :  { %v821_v33 = vmul.f32 %v1045_v32, %v813_v30  ;;  %v816_v34 = vadd.f32 %v954_v31, %v932_v28 }
 0x27c   :  { %v823_v37 = vadd.f32 %v821_v33, %v1224_v14  ;;  %v822_v38 = vmul.f32 %v1047_v35, %v816_v34 }
 0x27e   :  { %v832_v39 = vadd.f32 %v903_v36, %v823_v37  ;;  %v824_v40 = vadd.f32 %v822_v38, %v1230_v20 }
 0x280   :  { %v904_v41 = vmul.f32 -1.442695, %v832_v39  ;;  %v833_v42 = vadd.f32 %v903_v36, %v824_v40 }
 0x282   :  { %1048 = vpow2.f32 %v904_v41  ;;  %v905_v43 = vmul.f32 -1.442695, %v833_v42 }
 0x284   :  { %1050 = vpow2.f32 %v905_v43 }
 0x28c   :  { %v1049_v44 = vpop.eup %1048 }
 0x28d   :  { %v840_v45 = vadd.f32 1.0, %v1049_v44 }
 0x28e   :  { %v1051_v46 = vpop.eup %1050 }
 0x28f   :  { %1052 = vrcp.f32 %v840_v45  ;;  %v841_v47 = vadd.f32 1.0, %v1051_v46 }
 0x291   :  { %1054 = vrcp.f32 %v841_v47 }
 0x299   :  { %v1053_v48 = vpop.eup %1052 }
 0x29a   :  { %846 = vst.msk [vmem:[%s1320_s7] sm:$0xff] %vm73_vm1, %v1053_v48 }
 0x29b   :  { %v1055_v14 = vpop.eup %1054 }
 0x29c   :  { %847 = vst.msk [vmem:[%s1320_s7 + $0x8] sm:$0xff] %vm73_vm1, %v1055_v14 }

</bundles_post_ra>
